<compile_context>
chip_gen: v7x
topology: tpu7x:2x2x1
jax: 0.10.0
libtpu: 0.0.40
codegen_flags: <defaults>
</compile_context>

<pallas_src>
import jax
import jax.numpy as jnp
from jax.experimental import pallas as pl
from jax.experimental.pallas import tpu as pltpu

K_FEATURES = 10   # nn.Linear(10, 1): in_features
PACK = 128        # samples packed per reshaped row: 10 * 128 = 1280 lanes, dense


def _round_up(n, m):
    return ((n + m - 1) // m) * m


# ---------------------------------------------------------------------------
# Packed path: x viewed as (B/128, 1280); per-sample dot done on the MXU
# against a block-diagonal weight so 128 samples reduce into one output vreg.
# ---------------------------------------------------------------------------
def _linear_packed_kernel(x_ref, w_ref, b_ref, o_ref):
    """o[t, s] = sum_f x[t, s*10 + f] * w[f] + b.

    x_ref: (TB, 1280) f32 VMEM  (lane-dense; 128 samples per reshaped row)
    w_ref: (1280, 128) f32 VMEM (block-diagonal: w_ref[l, s] = w[l%10] iff l//10 == s)
    b_ref: (1,)        f32 SMEM
    o_ref: (TB, 128)   f32 VMEM (lane-dense output)
    """
    o_ref[...] = (
        jnp.dot(x_ref[...], w_ref[...], preferred_element_type=jnp.float32)
        + b_ref[0]
    )


def _forward_packed(x, w_vec, b_vec, *, row_tile):
    B, K = x.shape
    rows = B // PACK
    x_rs = x.reshape(rows, PACK * K)          # free reshape (row-major contiguous)

    # Block-diagonal weight: W[l, s] = w[l % K] if l // K == s else 0.
    lane = jnp.arange(PACK * K)
    w_big = jnp.where(
        (lane // K)[:, None] == jnp.arange(PACK)[None, :],
        w_vec[lane % K][:, None],
        jnp.float32(0.0),
    ).astype(jnp.float32)                     # (1280, 128) ~ 640 KiB, VMEM-resident

    # Tile choice: >= 2 grid steps when there is enough work (v7x has 2 TCs),
    # capped so the double-buffered working set stays ~12 MiB.
    if rows <= 8:
        tb = rows
    else:
        tb = min(row_tile, _round_up((rows + 1) // 2, 8))
    grid = (pl.cdiv(rows, tb),)

    cost = pl.CostEstimate(
        flops=2 * rows * (PACK * K) * PACK,
        transcendentals=0,
        bytes_accessed=4 * (B * K + PACK * K * PACK + B),
    )

    y_rs = pl.pallas_call(
        _linear_packed_kernel,
        out_shape=jax.ShapeDtypeStruct((rows, PACK), jnp.float32),
        grid=grid,
        in_specs=[
            pl.BlockSpec((tb, PACK * K), lambda i: (i, 0)),
            pl.BlockSpec(memory_space=pltpu.MemorySpace.VMEM),   # weight, resident
            pl.BlockSpec(memory_space=pltpu.MemorySpace.SMEM),   # bias scalar
        ],
        out_specs=pl.BlockSpec((tb, PACK), lambda i: (i, 0)),
        compiler_params=pltpu.CompilerParams(
            dimension_semantics=("parallel",),       # shard steps over v7x's 2 TCs
            vmem_limit_bytes=32 * 1024 * 1024,       # explicit: v5e default is 16 MiB
        ),
        cost_estimate=cost,
    )(x_rs, w_big, b_vec)

    return y_rs.reshape(B, 1)                 # free reshape back to (B, 1)


# ---------------------------------------------------------------------------
# Fallback rows path (any B, incl. tiny / non-multiple-of-128 batches):
# natural (tb, 10) blocks, VPU multiply + lane reduction.
# ---------------------------------------------------------------------------
def _linear_rows_kernel(x_ref, w_ref, b_ref, o_ref):
    """o[i, 0] = sum_f x[i, f] * w[0, f] + b.

    x_ref: (TB, 10) f32 VMEM
    w_ref: (1, 10)  f32 VMEM
    b_ref: (1,)     f32 SMEM
    o_ref: (TB, 1)  f32 VMEM
    """
    prod = x_ref[...] * w_ref[...]                       # broadcast over rows
    o_ref[...] = jnp.sum(prod, axis=1, keepdims=True) + b_ref[0]


def _forward_rows(x, w_vec, b_vec, *, row_tile):
    B, K = x.shape
    w_row = w_vec.reshape(1, K)

    if B <= 8:
        tb = B
    else:
        tb = min(row_tile, _round_up((B + 1) // 2, 8))
    grid = (pl.cdiv(B, tb),)

    cost = pl.CostEstimate(
        flops=2 * B * K,
        transcendentals=0,
        bytes_accessed=4 * (B * K + K + 1 + B),
    )

    y = pl.pallas_call(
        _linear_rows_kernel,
        out_shape=jax.ShapeDtypeStruct((B, 1), jnp.float32),
        grid=grid,
        in_specs=[
            pl.BlockSpec((tb, K), lambda i: (i, 0)),
            pl.BlockSpec(memory_space=pltpu.MemorySpace.VMEM),
            pl.BlockSpec(memory_space=pltpu.MemorySpace.SMEM),
        ],
        out_specs=pl.BlockSpec((tb, 1), lambda i: (i, 0)),
        compiler_params=pltpu.CompilerParams(
            dimension_semantics=("parallel",),
            vmem_limit_bytes=32 * 1024 * 1024,
        ),
        cost_estimate=cost,
    )(x, w_row, b_vec)
    return y


# ---------------------------------------------------------------------------
# Public forward: y = x @ w_pt.T + b   (PyTorch nn.Linear(10, 1) semantics)
# ---------------------------------------------------------------------------
def simple_model_forward(x, w_pt, b, *, packed_row_tile=1024, row_tile=8192):
    """x: (B, 10) f32, w_pt: (1, 10) f32 (PyTorch (out, in) layout), b: (1,) f32
    returns: (B, 1) f32."""
    if x.dtype != jnp.float32:
        x = x.astype(jnp.float32)
    B, K = x.shape
    N, K2 = w_pt.shape
    assert K == K2 == K_FEATURES and N == 1

    w_vec = w_pt.reshape(K).astype(jnp.float32)
    b_vec = b.reshape(N).astype(jnp.float32)

    if B >= PACK and B % PACK == 0:
        return _forward_packed(x, w_vec, b_vec, row_tile=packed_row_tile)
    return _forward_rows(x, w_vec, b_vec, row_tile=row_tile)


if __name__ == "__main__":
    key = jax.random.PRNGKey(0)
    kx1, kx2, kw, kb = jax.random.split(key, 4)

    in_features, out_features = K_FEATURES, 1

    # Deterministic parameter init mimicking nn.Linear defaults:
    # U(-1/sqrt(in_features), 1/sqrt(in_features))
    bound = 1.0 / jnp.sqrt(jnp.float32(in_features))
    w_pt = jax.random.uniform(
        kw, (out_features, in_features), jnp.float32, -bound, bound
    )
    b = jax.random.uniform(kb, (out_features,), jnp.float32, -bound, bound)

    # Small batch -> fallback rows kernel (single grid step).
    x_small = jax.random.normal(kx1, (8, in_features), jnp.float32)
    y_small = jax.block_until_ready(simple_model_forward(x_small, w_pt, b))
    ref_small = x_small @ w_pt.T + b
    assert y_small.shape == (8, out_features)
    assert jnp.allclose(y_small, ref_small, atol=1e-4, rtol=1e-5)

    # Multiple-of-128 batch -> packed MXU kernel with a 2-step "parallel" grid.
    x_big = jax.random.normal(kx2, (2048, in_features), jnp.float32)
    y_big = jax.block_until_ready(simple_model_forward(x_big, w_pt, b))
    ref_big = x_big @ w_pt.T + b
    assert y_big.shape == (2048, out_features)
    assert jnp.allclose(y_big, ref_big, atol=1e-4, rtol=1e-5)

    print("KERNEL_OK")
</pallas_src>

<mosaic_0001>
module attributes {stable_mosaic.version = 11 : i64} {
  func.func @_linear_rows_kernel(%arg0: i32, %arg1: memref<8x10xf32, #tpu.memory_space<vmem>>, %arg2: memref<1x10xf32, #tpu.memory_space<vmem>>, %arg3: memref<1xf32, #tpu.memory_space<smem>>, %arg4: memref<8x1xf32, #tpu.memory_space<vmem>>) attributes {dimension_semantics = [#tpu.dimension_semantics<parallel>], iteration_bounds = array<i64: 1>, scalar_prefetch = 0 : i64, scratch_operands = 0 : i64, tpu.core_type = #tpu.core_type<tc>, window_params = [{transform_indices = @transform_0, window_bounds = array<i64: 8, 10>}, {pipeline_mode = #tpu.pipeline_mode<synchronous>, transform_indices = @transform_1, window_bounds = array<i64: 1, 10>}, {transform_indices = @transform_2, window_bounds = array<i64: 1>}, {transform_indices = @transform_3, window_bounds = array<i64: 8, 1>}]} {
    %c0 = arith.constant 0 : index
    %c0_0 = arith.constant 0 : index
    %0 = vector.load %arg1[%c0, %c0_0] : memref<8x10xf32, #tpu.memory_space<vmem>>, vector<8x10xf32>
    %c0_1 = arith.constant 0 : index
    %c0_2 = arith.constant 0 : index
    %1 = vector.load %arg2[%c0_1, %c0_2] : memref<1x10xf32, #tpu.memory_space<vmem>>, vector<1x10xf32>
    %2 = vector.broadcast %1 : vector<1x10xf32> to vector<8x10xf32>
    %3 = arith.mulf %0, %2 : vector<8x10xf32>
    %cst = arith.constant dense<0.000000e+00> : vector<8xf32>
    %4 = vector.multi_reduction <add>, %3, %cst [1] : vector<8x10xf32> to vector<8xf32>
    %5 = vector.shape_cast %4 : vector<8xf32> to vector<8x1xf32>
    %c0_3 = arith.constant 0 : index
    %6 = memref.load %arg3[%c0_3] : memref<1xf32, #tpu.memory_space<smem>>
    %7 = vector.broadcast %6 : f32 to vector<8x1xf32>
    %8 = arith.addf %5, %7 : vector<8x1xf32>
    %c0_4 = arith.constant 0 : index
    %c0_5 = arith.constant 0 : index
    %9 = vector.load %arg4[%c0_4, %c0_5] : memref<8x1xf32, #tpu.memory_space<vmem>>, vector<8x1xf32>
    tpu.vector_store %arg4[%c0_4, %c0_5], %8 {strides = array<i32>} : memref<8x1xf32, #tpu.memory_space<vmem>>, vector<8x1xf32>,
    return
  }
  func.func @transform_0(%arg0: i32) -> (i32, i32) {
    %c0_i32 = arith.constant 0 : i32
    %c0_i32_0 = arith.constant 0 : i32
    return %arg0, %c0_i32 : i32, i32
  }
  func.func @transform_1(%arg0: i32) -> (i32, i32) {
    %c0_i32 = arith.constant 0 : i32
    %c0_i32_0 = arith.constant 0 : i32
    %c0_i32_1 = arith.constant 0 : i32
    return %c0_i32, %c0_i32_0 : i32, i32
  }
  func.func @transform_2(%arg0: i32) -> i32 {
    %c0_i32 = arith.constant 0 : i32
    %c0_i32_0 = arith.constant 0 : i32
    return %c0_i32 : i32
  }
  func.func @transform_3(%arg0: i32) -> (i32, i32) {
    %c0_i32 = arith.constant 0 : i32
    %c0_i32_0 = arith.constant 0 : i32
    return %arg0, %c0_i32 : i32, i32
  }
}

</mosaic_0001>

<bundles_post_ra>
// kernel: tpu_custom_call.1
= control target key start
LH: loop header
LB: loop body
LE: loop exit
PB: predicated region body
PF: predicated region fallthrough
CT: control target
= control target key end

     0   :  { %9 = vsyncpa [#allocation4], 0  ;;  %s76_s12 = smov [#allocation3]   ;;  %s118_s0 = inlined_call_operand.hbm [shape: f32[8,10], index: 0, kind: input, shape index: {}]   ;;  %s119_s1 = inlined_call_operand.vmem [shape: f32[1,10], index: 1, kind: input, shape index: {}]   ;;  %s120_s2 = inlined_call_operand.<no memory space> [shape: f32[1], index: 2, kind: input, shape index: {}]   ;;  %s121_s3 = inlined_call_operand.vmem [shape: f32[8,1], index: 3, kind: output, shape index: {}]  }
   0x1   :  { %s16_s13 = sshll.u32 %s76_s12, 4  ;;  %s52_s16 = scalar_lea.hbm %s118_s0, 128  ;;  %s17_s13 = int_to_ptr.vmem [resolvable:$true] %s16_s13 }
   0x2   :  { %p53_p0 = scmp.ne.s32.totalorder %s118_s0, %s52_s16  ;;  %p56_p1 = scmp.lt.u32.totalorder %s52_s16, %s118_s0 }
   0x4   :  { %p58_p2 = pnand %p56_p1, %p53_p0 }
   0x6   :  { %61 = shalt.err (!%p58_p2)
}
   0x7   :  { %s62_s21 = scalar_lea.vmem %s17_s13, 128  ;;  %p67_p4 = scmp.lt.s32.totalorder %s17_s13, %s17_s13 }
   0x8   :  { %p63_p3 = scmp.ne.s32.totalorder %s17_s13, %s62_s21  ;;  %p68_p5 = scmp.lt.s32.totalorder %s62_s21, %s62_s21 }
   0xa   :  { %p69_p6 = por %p68_p5, %p67_p4 }
   0xc   :  { %p70_p7 = pnand %p69_p6, %p63_p3 }
   0xe   :  { %73 = shalt.err (!%p70_p7)
}
   0xf   :  { %19 = dma.hbm_to_vmem [thread:$0]  %s118_s0, 128, %s17_s13, [#allocation4]  }
  0x10   :  { %74 = dma.done.wait [#allocation4], 128  }
  0x11   :  { %75 = vsyncadd [#allocation4], 4294967168  ;;  %v27_v0 = vld [vmem:[#allocation3] sm:$0xff]  ;;  %vm36_vm0 = vcmask 80896   ;;  %v41_v4 = vstv %s120_s2  ;;  %vm43_vm1 = vcmask 7168  }
  0x12   :  { %v50_v1 = vld [vmem:[%s119_s1] ss:$0 sm:$0xff] }
  0x13   :  { %v35_v2 = vmul.f32 %v50_v1, %v27_v0 }
  0x15   :  { %v37_v3 = vsel %vm36_vm0, %v35_v2, 0.0 }
  0x16   :  { %38 = vadd.xlane.f32.xlu0 %v37_v3 }
  0xa3   :  { %v39_v5 = vpop.xlane.xlu0 %38 }
  0xa4   :  { %v42_v6 = vadd.f32 %v41_v4, %v39_v5 }
  0xa6   :  { %44 = vst.msk [vmem:[%s121_s3] sm:$0xff] %vm43_vm1, %v42_v6 }
  0xa7   :  { %49 = vsyncpa [#allocation4], 1 }

</bundles_post_ra>
